<compile_context>
chip_gen: v6e
topology: v6e:2x2x1
jax: 0.10.0
libtpu: 0.0.40
codegen_flags: <defaults>
</compile_context>

<pallas_src>
import functools

import jax
import jax.numpy as jnp
from jax.experimental import pallas as pl
from jax.experimental.pallas import tpu as pltpu

HIDDEN = 256  # fixed by the module definition


def actor_kernel(act_dim, obs_ref, w1_ref, b1_ref, w2_ref, b2_ref,
                 whead_ref, bhead_ref, out_ref):
    # obs arrives as f32; cast to bf16 on the VPU (hidden under the MXU) so the
    # wrapper does not need a separate XLA cast pass over obs.
    x = obs_ref[...].astype(jnp.bfloat16)

    # net: Linear(obs_dim, 256) -> ReLU -> Linear(256, 256) -> ReLU
    h1 = jnp.dot(x, w1_ref[...], preferred_element_type=jnp.float32) + b1_ref[...]
    h1 = jnp.maximum(h1, 0.0)
    h2 = jnp.dot(h1.astype(jnp.bfloat16), w2_ref[...],
                 preferred_element_type=jnp.float32) + b2_ref[...]
    h2 = jnp.maximum(h2, 0.0)

    # Fused heads: one matmul producing [mu | log_std] side by side.
    head = jnp.dot(h2.astype(jnp.bfloat16), whead_ref[...],
                   preferred_element_type=jnp.float32) + bhead_ref[...]

    # Left half (cols < act_dim) is mu; right half becomes std = clamp+exp+clamp.
    # (mu columns are also clipped/exp'ed but discarded by the where; clip to 2
    # first guarantees no Inf leaks.)
    col = jax.lax.broadcasted_iota(jnp.int32, head.shape, dimension=1)
    log_std = jnp.clip(head, -20.0, 2.0)
    std = jnp.maximum(jnp.exp(log_std), 1e-6)
    out_ref[...] = jnp.where(col < act_dim, head, std).astype(out_ref.dtype)


def _round_up(x, m):
    return ((x + m - 1) // m) * m


def _choose_tile(B, tb_max):
    """Batch tile choice per review: big tiles for throughput, small-batch path,
    and >=2 tiles for large single-tile batches so v7x's 2 TCs both work."""
    tb_max = max(16, _round_up(int(tb_max), 16))
    if B <= 256:
        # Tiny inference-style batches: don't pad B=8 up to a 256-row tile.
        return min(tb_max, _round_up(max(B, 16), 16))
    if B <= tb_max:
        # Would fit a single tile; split into two so the "parallel" batch axis
        # gives both v7x TensorCores work (harmless on 1-TC v5e/v6e).
        return _round_up(-(-B // 2), 16)
    return tb_max


def _padded_vmem_bytes(rows, cols, dtype):
    """VMEM storage of a (rows, cols) array after (8*pack, 128) tile padding."""
    itemsize = jnp.dtype(dtype).itemsize
    pack = max(1, 4 // itemsize)  # bf16 packs 2 rows per 32-bit sublane
    return _round_up(rows, 8 * pack) * _round_up(max(cols, 1), 128) * itemsize


def prepare_actor_params(params):
    """One-time parameter prep (hoisted out of the per-call path):
    bf16 weight casts + fusion of the mu/log_std heads into a single matmul."""
    w1, b1, w2, b2, wmu, bmu, wls, bls = params
    whead = jnp.concatenate([wmu, wls], axis=1)
    bhead = jnp.concatenate([bmu, bls], axis=1)
    return (w1.astype(jnp.bfloat16), b1.astype(jnp.float32),
            w2.astype(jnp.bfloat16), b2.astype(jnp.float32),
            whead.astype(jnp.bfloat16), bhead.astype(jnp.float32))


def actor_forward(obs, kernel_params, *, tb=2048):
    """Actor.forward: returns (mu, std). `kernel_params` = prepare_actor_params(...)."""
    w1_bf, b1, w2_bf, b2, wh_bf, bhead = kernel_params
    B, obs_dim = obs.shape
    two_a = wh_bf.shape[1]
    act_dim = two_a // 2

    obs = obs.astype(jnp.float32)  # no bf16 cast here; done inside the kernel

    tb = _choose_tile(B, tb)
    n_tiles = pl.cdiv(B, tb)
    Bp = n_tiles * tb
    if Bp != B:
        obs = jnp.pad(obs, ((0, Bp - B), (0, 0)))

    # Honest VMEM budget for the chosen tb (tile-padded storage, double-buffered
    # blocks, f32 activation scratch), 2x headroom for Mosaic internals; small
    # 4 MiB floor / 32 MiB cap keeps it safe on every generation incl. v7x.
    weight_bytes = 2 * (_padded_vmem_bytes(obs_dim, HIDDEN, jnp.bfloat16)
                        + _padded_vmem_bytes(HIDDEN, HIDDEN, jnp.bfloat16)
                        + _padded_vmem_bytes(HIDDEN, two_a, jnp.bfloat16)
                        + _padded_vmem_bytes(1, HIDDEN, jnp.float32) * 2
                        + _padded_vmem_bytes(1, two_a, jnp.float32))
    tile_bytes = 2 * (_padded_vmem_bytes(tb, obs_dim, jnp.float32)
                      + _padded_vmem_bytes(tb, two_a, jnp.float32))
    scratch_bytes = 2 * _padded_vmem_bytes(tb, HIDDEN, jnp.float32)  # h1 / h2
    vmem_limit = int(2 * (weight_bytes + tile_bytes + scratch_bytes))
    vmem_limit = min(32 << 20, max(4 << 20, vmem_limit))

    out = pl.pallas_call(
        functools.partial(actor_kernel, act_dim),
        out_shape=jax.ShapeDtypeStruct((Bp, two_a), jnp.float32),
        grid=(n_tiles,),
        in_specs=[
            pl.BlockSpec((tb, obs_dim), lambda i: (i, 0)),       # obs tile (f32)
            pl.BlockSpec((obs_dim, HIDDEN), lambda i: (0, 0)),   # w1 (resident)
            pl.BlockSpec((1, HIDDEN), lambda i: (0, 0)),         # b1
            pl.BlockSpec((HIDDEN, HIDDEN), lambda i: (0, 0)),    # w2 (resident)
            pl.BlockSpec((1, HIDDEN), lambda i: (0, 0)),         # b2
            pl.BlockSpec((HIDDEN, two_a), lambda i: (0, 0)),     # fused head W
            pl.BlockSpec((1, two_a), lambda i: (0, 0)),          # fused head b
        ],
        out_specs=pl.BlockSpec((tb, two_a), lambda i: (i, 0)),
        compiler_params=pltpu.CompilerParams(
            dimension_semantics=("parallel",),
            vmem_limit_bytes=vmem_limit,
        ),
    )(obs, w1_bf, b1, w2_bf, b2, wh_bf, bhead)

    mu = out[:B, :act_dim]
    std = out[:B, act_dim:]
    return mu, std


def init_linear(key, fan_in, fan_out):
    """Deterministic init matching nn.Linear's default U(-1/sqrt(fan_in), 1/sqrt(fan_in)).

    Weight returned as [fan_in, fan_out] (already transposed for x @ W)."""
    kw, kb = jax.random.split(key)
    bound = 1.0 / jnp.sqrt(jnp.float32(fan_in))
    w = jax.random.uniform(kw, (fan_in, fan_out), jnp.float32, -bound, bound)
    b = jax.random.uniform(kb, (1, fan_out), jnp.float32, -bound, bound)
    return w, b


def make_actor_params(key, obs_dim, act_dim):
    k1, k2, k3, k4 = jax.random.split(key, 4)
    w1, b1 = init_linear(k1, obs_dim, HIDDEN)
    w2, b2 = init_linear(k2, HIDDEN, HIDDEN)
    wmu, bmu = init_linear(k3, HIDDEN, act_dim)
    wls, bls = init_linear(k4, HIDDEN, act_dim)
    return (w1, b1, w2, b2, wmu, bmu, wls, bls)


def actor_forward_ref(obs, params):
    """Pure-JAX f32 reference for correctness checking."""
    w1, b1, w2, b2, wmu, bmu, wls, bls = params
    h1 = jnp.maximum(obs @ w1 + b1, 0.0)
    h2 = jnp.maximum(h1 @ w2 + b2, 0.0)
    mu = h2 @ wmu + bmu
    log_std = jnp.clip(h2 @ wls + bls, -20.0, 2.0)
    std = jnp.maximum(jnp.exp(log_std), 1e-6)
    return mu, std


# TODO(synk): Actor.sample() uses torch.distributions.Normal.rsample (host RNG
# reparameterized sampling + tanh-squashed log-prob); only the deterministic
# forward() is implemented here.

if __name__ == "__main__":
    key = jax.random.PRNGKey(0)
    k_obs, k_params, k_obs2 = jax.random.split(key, 3)

    obs_dim, act_dim = 32, 8
    params = make_actor_params(k_params, obs_dim, act_dim)
    kernel_params = prepare_actor_params(params)  # hoisted: done once, reused

    # Small inference-style batch (exercises the small-batch tile path).
    B = 8
    obs = jax.random.normal(k_obs, (B, obs_dim), jnp.float32)
    mu, std = actor_forward(obs, kernel_params)
    jax.block_until_ready((mu, std))

    mu_ref, std_ref = actor_forward_ref(obs, params)
    assert mu.shape == (B, act_dim) and std.shape == (B, act_dim)
    # bf16 matmul operands -> relaxed tolerance vs. the f32 reference.
    assert jnp.allclose(mu, mu_ref, atol=3e-2, rtol=5e-2)
    assert jnp.allclose(std, std_ref, atol=3e-2, rtol=5e-2)

    # Larger training-style batch (exercises the multi-tile / padded path and
    # the n_tiles >= 2 split for v7x).
    B2 = 300
    obs2 = jax.random.normal(k_obs2, (B2, obs_dim), jnp.float32)
    mu2, std2 = actor_forward(obs2, kernel_params)
    jax.block_until_ready((mu2, std2))

    mu2_ref, std2_ref = actor_forward_ref(obs2, params)
    assert mu2.shape == (B2, act_dim) and std2.shape == (B2, act_dim)
    assert jnp.allclose(mu2, mu2_ref, atol=3e-2, rtol=5e-2)
    assert jnp.allclose(std2, std2_ref, atol=3e-2, rtol=5e-2)

    print("KERNEL_OK")
</pallas_src>

<mosaic_0001>
module attributes {stable_mosaic.version = 11 : i64} {
  func.func @actor_kernel(%arg0: i32, %arg1: memref<16x32xf32, #tpu.memory_space<vmem>>, %arg2: memref<32x256xbf16, #tpu.memory_space<vmem>>, %arg3: memref<1x256xf32, #tpu.memory_space<vmem>>, %arg4: memref<256x256xbf16, #tpu.memory_space<vmem>>, %arg5: memref<1x256xf32, #tpu.memory_space<vmem>>, %arg6: memref<256x16xbf16, #tpu.memory_space<vmem>>, %arg7: memref<1x16xf32, #tpu.memory_space<vmem>>, %arg8: memref<16x16xf32, #tpu.memory_space<vmem>>) attributes {dimension_semantics = [#tpu.dimension_semantics<parallel>], iteration_bounds = array<i64: 1>, scalar_prefetch = 0 : i64, scratch_operands = 0 : i64, tpu.core_type = #tpu.core_type<tc>, window_params = [{transform_indices = @transform_0, window_bounds = array<i64: 16, 32>}, {pipeline_mode = #tpu.pipeline_mode<synchronous>, transform_indices = @transform_1, window_bounds = array<i64: 32, 256>}, {pipeline_mode = #tpu.pipeline_mode<synchronous>, transform_indices = @transform_2, window_bounds = array<i64: 1, 256>}, {pipeline_mode = #tpu.pipeline_mode<synchronous>, transform_indices = @transform_3, window_bounds = array<i64: 256, 256>}, {pipeline_mode = #tpu.pipeline_mode<synchronous>, transform_indices = @transform_4, window_bounds = array<i64: 1, 256>}, {pipeline_mode = #tpu.pipeline_mode<synchronous>, transform_indices = @transform_5, window_bounds = array<i64: 256, 16>}, {pipeline_mode = #tpu.pipeline_mode<synchronous>, transform_indices = @transform_6, window_bounds = array<i64: 1, 16>}, {transform_indices = @transform_7, window_bounds = array<i64: 16, 16>}]} {
    %c0 = arith.constant 0 : index
    %c0_0 = arith.constant 0 : index
    %0 = vector.load %arg1[%c0, %c0_0] : memref<16x32xf32, #tpu.memory_space<vmem>>, vector<16x32xf32>
    %1 = arith.truncf %0 : vector<16x32xf32> to vector<16x32xbf16>
    %c0_1 = arith.constant 0 : index
    %c0_2 = arith.constant 0 : index
    %2 = vector.load %arg2[%c0_1, %c0_2] : memref<32x256xbf16, #tpu.memory_space<vmem>>, vector<32x256xbf16>
    %cst = arith.constant dense<0.000000e+00> : vector<16x256xf32>
    %3 = tpu.matmul %1, %2, %cst {dimension_numbers = #tpu.dot_dimension_numbers<[1], [0], [0], [1], [0, 0, 1, 1], [], []>} : vector<16x32xbf16>, vector<32x256xbf16>, vector<16x256xf32> -> vector<16x256xf32>
    %c0_3 = arith.constant 0 : index
    %c0_4 = arith.constant 0 : index
    %4 = vector.load %arg3[%c0_3, %c0_4] : memref<1x256xf32, #tpu.memory_space<vmem>>, vector<1x256xf32>
    %5 = vector.broadcast %4 : vector<1x256xf32> to vector<16x256xf32>
    %6 = arith.addf %3, %5 : vector<16x256xf32>
    %cst_5 = arith.constant 0.000000e+00 : f32
    %7 = vector.broadcast %cst_5 : f32 to vector<16x256xf32>
    %8 = arith.maximumf %6, %7 : vector<16x256xf32>
    %9 = arith.truncf %8 : vector<16x256xf32> to vector<16x256xbf16>
    %c0_6 = arith.constant 0 : index
    %c0_7 = arith.constant 0 : index
    %10 = vector.load %arg4[%c0_6, %c0_7] : memref<256x256xbf16, #tpu.memory_space<vmem>>, vector<256x256xbf16>
    %cst_8 = arith.constant dense<0.000000e+00> : vector<16x256xf32>
    %11 = tpu.matmul %9, %10, %cst_8 {dimension_numbers = #tpu.dot_dimension_numbers<[1], [0], [0], [1], [0, 0, 1, 1], [], []>} : vector<16x256xbf16>, vector<256x256xbf16>, vector<16x256xf32> -> vector<16x256xf32>
    %c0_9 = arith.constant 0 : index
    %c0_10 = arith.constant 0 : index
    %12 = vector.load %arg5[%c0_9, %c0_10] : memref<1x256xf32, #tpu.memory_space<vmem>>, vector<1x256xf32>
    %13 = vector.broadcast %12 : vector<1x256xf32> to vector<16x256xf32>
    %14 = arith.addf %11, %13 : vector<16x256xf32>
    %cst_11 = arith.constant 0.000000e+00 : f32
    %15 = vector.broadcast %cst_11 : f32 to vector<16x256xf32>
    %16 = arith.maximumf %14, %15 : vector<16x256xf32>
    %17 = arith.truncf %16 : vector<16x256xf32> to vector<16x256xbf16>
    %c0_12 = arith.constant 0 : index
    %c0_13 = arith.constant 0 : index
    %18 = vector.load %arg6[%c0_12, %c0_13] : memref<256x16xbf16, #tpu.memory_space<vmem>>, vector<256x16xbf16>
    %cst_14 = arith.constant dense<0.000000e+00> : vector<16x16xf32>
    %19 = tpu.matmul %17, %18, %cst_14 {dimension_numbers = #tpu.dot_dimension_numbers<[1], [0], [0], [1], [0, 0, 1, 1], [], []>} : vector<16x256xbf16>, vector<256x16xbf16>, vector<16x16xf32> -> vector<16x16xf32>
    %c0_15 = arith.constant 0 : index
    %c0_16 = arith.constant 0 : index
    %20 = vector.load %arg7[%c0_15, %c0_16] : memref<1x16xf32, #tpu.memory_space<vmem>>, vector<1x16xf32>
    %21 = vector.broadcast %20 : vector<1x16xf32> to vector<16x16xf32>
    %22 = arith.addf %19, %21 : vector<16x16xf32>
    %23 = tpu.iota {dimensions = array<i32: 1>} : vector<16x16xi32>
    %cst_17 = arith.constant -2.000000e+01 : f32
    %cst_18 = arith.constant 2.000000e+00 : f32
    %24 = vector.broadcast %cst_17 : f32 to vector<16x16xf32>
    %25 = arith.maximumf %24, %22 : vector<16x16xf32>
    %26 = vector.broadcast %cst_18 : f32 to vector<16x16xf32>
    %27 = arith.minimumf %26, %25 : vector<16x16xf32>
    %28 = math.exp %27 : vector<16x16xf32>
    %cst_19 = arith.constant 9.99999997E-7 : f32
    %29 = vector.broadcast %cst_19 : f32 to vector<16x16xf32>
    %30 = arith.maximumf %28, %29 : vector<16x16xf32>
    %c8_i32 = arith.constant 8 : i32
    %31 = vector.broadcast %c8_i32 : i32 to vector<16x16xi32>
    %32 = arith.cmpi slt, %23, %31 : vector<16x16xi32>
    %33 = arith.select %32, %22, %30 : vector<16x16xi1>, vector<16x16xf32>
    %c0_20 = arith.constant 0 : index
    %c0_21 = arith.constant 0 : index
    %34 = vector.load %arg8[%c0_20, %c0_21] : memref<16x16xf32, #tpu.memory_space<vmem>>, vector<16x16xf32>
    tpu.vector_store %arg8[%c0_20, %c0_21], %33 {strides = array<i32>} : memref<16x16xf32, #tpu.memory_space<vmem>>, vector<16x16xf32>,
    return
  }
  func.func @transform_0(%arg0: i32) -> (i32, i32) {
    %c0_i32 = arith.constant 0 : i32
    %c0_i32_0 = arith.constant 0 : i32
    return %arg0, %c0_i32 : i32, i32
  }
  func.func @transform_1(%arg0: i32) -> (i32, i32) {
    %c0_i32 = arith.constant 0 : i32
    %c0_i32_0 = arith.constant 0 : i32
    %c0_i32_1 = arith.constant 0 : i32
    return %c0_i32, %c0_i32_0 : i32, i32
  }
  func.func @transform_2(%arg0: i32) -> (i32, i32) {
    %c0_i32 = arith.constant 0 : i32
    %c0_i32_0 = arith.constant 0 : i32
    %c0_i32_1 = arith.constant 0 : i32
    return %c0_i32, %c0_i32_0 : i32, i32
  }
  func.func @transform_3(%arg0: i32) -> (i32, i32) {
    %c0_i32 = arith.constant 0 : i32
    %c0_i32_0 = arith.constant 0 : i32
    %c0_i32_1 = arith.constant 0 : i32
    return %c0_i32, %c0_i32_0 : i32, i32
  }
  func.func @transform_4(%arg0: i32) -> (i32, i32) {
    %c0_i32 = arith.constant 0 : i32
    %c0_i32_0 = arith.constant 0 : i32
    %c0_i32_1 = arith.constant 0 : i32
    return %c0_i32, %c0_i32_0 : i32, i32
  }
  func.func @transform_5(%arg0: i32) -> (i32, i32) {
    %c0_i32 = arith.constant 0 : i32
    %c0_i32_0 = arith.constant 0 : i32
    %c0_i32_1 = arith.constant 0 : i32
    return %c0_i32, %c0_i32_0 : i32, i32
  }
  func.func @transform_6(%arg0: i32) -> (i32, i32) {
    %c0_i32 = arith.constant 0 : i32
    %c0_i32_0 = arith.constant 0 : i32
    %c0_i32_1 = arith.constant 0 : i32
    return %c0_i32, %c0_i32_0 : i32, i32
  }
  func.func @transform_7(%arg0: i32) -> (i32, i32) {
    %c0_i32 = arith.constant 0 : i32
    %c0_i32_0 = arith.constant 0 : i32
    return %arg0, %c0_i32 : i32, i32
  }
}

</mosaic_0001>

<bundles_post_ra>
// kernel: tpu_custom_call.1
= control target key start
LH: loop header
LB: loop body
LE: loop exit
PB: predicated region body
PF: predicated region fallthrough
CT: control target
= control target key end

     0   :  { %12 = vsyncpa [#allocation3], 0  ;;  %s931_s0 = inlined_call_operand.vmem [shape: f32[16,32], index: 0, kind: input, shape index: {}]   ;;  %s932_s1 = inlined_call_operand.vmem [shape: bf16[32,256], index: 1, kind: input, shape index: {}]   ;;  %s933_s2 = inlined_call_operand.vmem [shape: f32[1,256], index: 2, kind: input, shape index: {}]   ;;  %s934_s3 = inlined_call_operand.hbm [shape: bf16[256,256], index: 3, kind: input, shape index: {}]   ;;  %s935_s4 = inlined_call_operand.vmem [shape: f32[1,256], index: 4, kind: input, shape index: {}]   ;;  %s936_s5 = inlined_call_operand.vmem [shape: bf16[256,16], index: 5, kind: input, shape index: {}]   ;;  %s937_s6 = inlined_call_operand.vmem [shape: f32[1,16], index: 6, kind: input, shape index: {}]   ;;  %s938_s7 = inlined_call_operand.hbm [shape: f32[16,16], index: 7, kind: output, shape index: {}]  }
   0x1   :  { %13 = vsyncpa [#allocation4], 0  ;;  %s797_s24 = smov [#allocation2]  }
   0x2   :  { %s25_s25 = sshll.u32 %s797_s24, 4  ;;  %s26_s25 = int_to_ptr.vmem [resolvable:$true] %s25_s25 }
   0x3   :  { %s761_s26 = scalar_lea.vmem %s26_s25, 4096  ;;  %p766_p1 = scmp.lt.s32.totalorder %s26_s25, %s26_s25 }
   0x4   :  { %p762_p0 = scmp.ne.s32.totalorder %s26_s25, %s761_s26  ;;  %p767_p2 = scmp.lt.s32.totalorder %s761_s26, %s761_s26 }
   0x6   :  { %p768_p3 = por %p767_p2, %p766_p1 }
   0x8   :  { %p769_p4 = pnand %p768_p3, %p762_p0 }
   0xa   :  { %772 = shalt.err (!%p769_p4)
}
   0xb   :  { %s798_s27 = smov 128   ;;  %s799_s28 = smov 8  }
   0xc   :  { %31 = dma.hbm_to_vmem [thread:$0]  %s934_s3, 4096, %s26_s25, [#allocation3], %s798_s27, %s798_s27, %s799_s28  }
   0xd   :  { %793 = dma.done.wait [#allocation3], 4096  }
   0xe   :  { %794 = vsyncadd [#allocation3], 4294963200  ;;  %v800_v0 = vmov 0   ;;  %v679_v1 = vld [vmem:[%s932_s1 + $0x14] ss:$8 sps:$4 sm:$0xff]   ;;  %v42_v5 = vld [vmem:[%s931_s0] sm:$0xff]  ;;  %v51_v50 = vlaneseq }
   0xf   :  { %117 = vmatprep.mubr.bf16.mxu0 %v800_v0  ;;  %v681_v2 = vld [vmem:[%s932_s1 + $0x10] ss:$8 sps:$4 sm:$0xff]   ;;  %97 = vmatprep.subr.bf16.mxu0 %v679_v1  ;;  %v682_v3 = vld [vmem:[%s932_s1 + $0x4] ss:$8 sps:$4 sm:$0xff]   ;;  %v684_v4 = vld [vmem:[%s932_s1] ss:$8 sps:$4 sm:$0xff]  }
  0x10   :  { %98 = vmatpush1.bf16.msra.mxu0 %v681_v2  ;;  %v43_v6 = vld [vmem:[%s931_s0 + $0x8] sm:$0xff]  ;;  %v685_v7 = vld [vmem:[#allocation2 + $0x74] ss:$8 sps:$4 sm:$0xff]   ;;  %v687_v8 = vld [vmem:[#allocation2 + $0x70] ss:$8 sps:$4 sm:$0xff]   ;;  %vm81_vm0 = vcmask 261120  }
  0x11   :  { %99 = vmatprep.subr.bf16.mxu0 %v682_v3  ;;  %v688_v9 = vld [vmem:[#allocation2 + $0x64] ss:$8 sps:$4 sm:$0xff]   ;;  %v44_v10 = vpack.c.bf16 %v43_v6, %v42_v5  ;;  %338 = vmatprep.subr.bf16.mxu1 %v685_v7  ;;  %v690_v11 = vld [vmem:[#allocation2 + $0x60] ss:$8 sps:$4 sm:$0xff]   ;;  %v691_v12 = vld [vmem:[#allocation2 + $0x54] ss:$8 sps:$4 sm:$0xff]  }
  0x12   :  { %339 = vmatpush1.bf16.msra.mxu1 %v687_v8  ;;  %v693_v13 = vld [vmem:[#allocation2 + $0x50] ss:$8 sps:$4 sm:$0xff]   ;;  %v694_v14 = vld [vmem:[#allocation2 + $0x44] ss:$8 sps:$4 sm:$0xff]   ;;  %v696_v15 = vld [vmem:[#allocation2 + $0x40] ss:$8 sps:$4 sm:$0xff]  }
  0x13   :  { %340 = vmatprep.subr.bf16.mxu1 %v688_v9  ;;  %v697_v16 = vld [vmem:[#allocation2 + $0x34] ss:$8 sps:$4 sm:$0xff]   ;;  %v699_v17 = vld [vmem:[#allocation2 + $0x30] ss:$8 sps:$4 sm:$0xff]   ;;  %v700_v18 = vld [vmem:[#allocation2 + $0x24] ss:$8 sps:$4 sm:$0xff]  }
  0x14   :  { %100 = vmatpush1.bf16.msra.mxu0 %v684_v4  ;;  %v702_v19 = vld [vmem:[#allocation2 + $0x20] ss:$8 sps:$4 sm:$0xff]   ;;  %v703_v20 = vld [vmem:[#allocation2 + $0x14] ss:$8 sps:$4 sm:$0xff]   ;;  %v705_v21 = vld [vmem:[#allocation2 + $0x10] ss:$8 sps:$4 sm:$0xff]  }
  0x15   :  { %v706_v22 = vld [vmem:[#allocation2 + $0x4] ss:$8 sps:$4 sm:$0xff]   ;;  %v708_v23 = vld [vmem:[#allocation2] ss:$8 sps:$4 sm:$0xff]   ;;  %v709_v24 = vld [vmem:[#allocation2 + $0xf4] ss:$8 sps:$4 sm:$0xff]  }
  0x16   :  { %341 = vmatpush1.bf16.msra.mxu1 %v690_v11  ;;  %v711_v25 = vld [vmem:[#allocation2 + $0xf0] ss:$8 sps:$4 sm:$0xff]   ;;  %v712_v26 = vld [vmem:[#allocation2 + $0xe4] ss:$8 sps:$4 sm:$0xff]   ;;  %v714_v27 = vld [vmem:[#allocation2 + $0xe0] ss:$8 sps:$4 sm:$0xff]  }
  0x17   :  { %602 = vmatmul.mubr.msk.bf16.vlgmr.msra.gmra.mxu0 %vm81_vm0, %v44_v10  ;;  %342 = vmatprep.subr.bf16.mxu1 %v691_v12  ;;  %v715_v28 = vld [vmem:[#allocation2 + $0xd4] ss:$8 sps:$4 sm:$0xff]   ;;  %v717_v29 = vld [vmem:[#allocation2 + $0xd0] ss:$8 sps:$4 sm:$0xff]   ;;  %v718_v30 = vld [vmem:[#allocation2 + $0xc4] ss:$8 sps:$4 sm:$0xff]  }
  0x18   :  { %v720_v31 = vld [vmem:[#allocation2 + $0xc0] ss:$8 sps:$4 sm:$0xff]   ;;  %v721_v32 = vld [vmem:[#allocation2 + $0xb4] ss:$8 sps:$4 sm:$0xff]   ;;  %v723_v33 = vld [vmem:[#allocation2 + $0xb0] ss:$8 sps:$4 sm:$0xff]  }
  0x19   :  { %v724_v34 = vld [vmem:[#allocation2 + $0xa4] ss:$8 sps:$4 sm:$0xff]   ;;  %v726_v35 = vld [vmem:[#allocation2 + $0xa0] ss:$8 sps:$4 sm:$0xff]   ;;  %v727_v36 = vld [vmem:[#allocation2 + $0x94] ss:$8 sps:$4 sm:$0xff]  }
  0x1a   :  { %343 = vmatpush1.bf16.msra.mxu1 %v693_v13  ;;  %v729_v37 = vld [vmem:[#allocation2 + $0x90] ss:$8 sps:$4 sm:$0xff]   ;;  %v730_v38 = vld [vmem:[#allocation2 + $0x84] ss:$8 sps:$4 sm:$0xff]   ;;  %v732_v39 = vld [vmem:[#allocation2 + $0x80] ss:$8 sps:$4 sm:$0xff]  }
  0x1b   :  { %344 = vmatprep.subr.bf16.mxu1 %v694_v14  ;;  %v733_v40 = vld [vmem:[%s936_s5 + $0x78] sm:$0xff]   ;;  %v735_v42 = vld [vmem:[%s936_s5 + $0x70] sm:$0xff]   ;;  %v737_v44 = vld [vmem:[%s936_s5 + $0x68] sm:$0xff]   ;;  %v52_v51 = vshrl.u32 %v51_v50, 7  ;;  %vm578_vm2 = vcmask 130048  }
  0x1c   :  { %v734_v41 = vld [vmem:[%s936_s5 + $0x38] sm:$0xff]   ;;  %652 = vmatprep.subr.bf16.mxu0 %v733_v40  ;;  %v736_v43 = vld [vmem:[%s936_s5 + $0x30] sm:$0xff]   ;;  %v738_v45 = vld [vmem:[%s936_s5 + $0x28] sm:$0xff]  }
  0x1d   :  { %653 = vmatpush3.bf16.msra.mxu0 %v734_v41  ;;  %v739_v46 = vld [vmem:[%s936_s5 + $0x60] sm:$0xff]   ;;  %v741_v48 = vld [vmem:[%s936_s5 + $0x58] sm:$0xff]   ;;  %v57_v52 = vsub.s32 1, %v52_v51  ;;  %v53_v53 = vsub.s32 0, %v52_v51  ;;  %v743_v7 = vld [vmem:[%s936_s5 + $0x50] sm:$0xff]  }
  0x1e   :  { %345 = vmatpush1.bf16.msra.mxu1 %v696_v15  ;;  %654 = vmatprep.subr.bf16.mxu0 %v735_v42  ;;  %v740_v47 = vld [vmem:[%s936_s5 + $0x20] sm:$0xff]   ;;  %v742_v49 = vld [vmem:[%s936_s5 + $0x18] sm:$0xff]   ;;  %v744_v8 = vld [vmem:[%s936_s5 + $0x10] sm:$0xff]  }
  0x1f   :  { %346 = vmatprep.subr.bf16.mxu1 %v697_v16  ;;  %v49_v54 = vld [vmem:[%s933_s2] sm:$0x3]  ;;  %v745_v9 = vld [vmem:[%s936_s5 + $0x48] sm:$0xff]  }
  0x20   :  { %v58_v56 = vrot.slane %v49_v54, %v57_v52  ;;  %v54_v57 = vrot.slane %v49_v54, %v53_v53  ;;  %v746_v10 = vld [vmem:[%s936_s5 + $0x8] sm:$0xff]   ;;  %v747_v11 = vld [vmem:[%s936_s5 + $0x40] sm:$0xff]  }
  0x21   :  { %655 = vmatpush3.bf16.msra.mxu0 %v736_v43  ;;  %v748_v12 = vld [vmem:[%s936_s5] sm:$0xff]  }
  0x22   :  { %347 = vmatpush1.bf16.msra.mxu1 %v699_v17  ;;  %656 = vmatprep.subr.bf16.mxu0 %v737_v44  ;;  %v166_v13 = vld [vmem:[%s935_s4] sm:$0x3] }
  0x23   :  { %348 = vmatprep.subr.bf16.mxu1 %v700_v18  ;;  %v175_v15 = vrot.slane %v166_v13, %v57_v52  ;;  %v171_v16 = vrot.slane %v166_v13, %v53_v53 }
  0x25   :  { %657 = vmatpush3.bf16.msra.mxu0 %v738_v45  ;;  %v564_v45 = vand.u32 127, %v51_v50 }
  0x26   :  { %349 = vmatpush1.bf16.msra.mxu1 %v702_v19  ;;  %658 = vmatprep.subr.bf16.mxu0 %v739_v46 }
  0x27   :  { %350 = vmatprep.subr.bf16.mxu1 %v703_v20  ;;  %vm575_vm1 = vcmp.lt.s32.totalorder %v564_v45, 8 }
  0x29   :  { %659 = vmatpush3.bf16.msra.mxu0 %v740_v47 }
  0x2a   :  { %351 = vmatpush1.bf16.msra.mxu1 %v705_v21  ;;  %660 = vmatprep.subr.bf16.mxu0 %v741_v48 }
  0x2b   :  { %352 = vmatprep.subr.bf16.mxu1 %v706_v22 }
  0x2d   :  { %661 = vmatpush3.bf16.msra.mxu0 %v742_v49 }
  0x2e   :  { %353 = vmatpush1.bf16.msra.mxu1 %v708_v23  ;;  %662 = vmatprep.subr.bf16.mxu0 %v743_v7 }
  0x2f   :  { %354 = vmatprep.subr.bf16.mxu1 %v709_v24 }
  0x31   :  { %663 = vmatpush3.bf16.msra.mxu0 %v744_v8 }
  0x32   :  { %355 = vmatpush2.bf16.msra.mxu1 %v711_v25  ;;  %664 = vmatprep.subr.bf16.mxu0 %v745_v9 }
  0x33   :  { %356 = vmatprep.subr.bf16.mxu1 %v712_v26 }
  0x35   :  { %665 = vmatpush3.bf16.msra.mxu0 %v746_v10 }
  0x36   :  { %357 = vmatpush2.bf16.msra.mxu1 %v714_v27  ;;  %666 = vmatprep.subr.bf16.mxu0 %v747_v11 }
  0x37   :  { %358 = vmatprep.subr.bf16.mxu1 %v715_v28 }
  0x39   :  { %667 = vmatpush3.bf16.msra.mxu0 %v748_v12 }
  0x3a   :  { %359 = vmatpush2.bf16.msra.mxu1 %v717_v29 }
  0x3b   :  { %360 = vmatprep.subr.bf16.mxu1 %v718_v30 }
  0x3e   :  { %361 = vmatpush2.bf16.msra.mxu1 %v720_v31  ;;  %v635_v31 = vld [vmem:[%s937_s6] ss:$0 sm:$0xff]  ;;  %s801_s6 = smov [#allocation5]  }
  0x3f   :  { %362 = vmatprep.subr.bf16.mxu1 %v721_v32  ;;  %s586_s30 = sshll.u32 %s801_s6, 4  ;;  %s587_s30 = int_to_ptr.vmem [resolvable:$true] %s586_s30 }
  0x40   :  { %s773_s8 = scalar_lea.vmem %s587_s30, 256  ;;  %p778_p6 = scmp.lt.s32.totalorder %s587_s30, %s587_s30 }
  0x41   :  { %p774_p5 = scmp.ne.s32.totalorder %s587_s30, %s773_s8  ;;  %p779_p7 = scmp.lt.s32.totalorder %s773_s8, %s773_s8 }
  0x42   :  { %363 = vmatpush2.bf16.msra.mxu1 %v723_v33 }
  0x43   :  { %364 = vmatprep.subr.bf16.mxu1 %v724_v34  ;;  %p780_p8 = por %p779_p7, %p778_p6 }
  0x45   :  { %p781_p9 = pnand %p780_p8, %p774_p5 }
  0x46   :  { %365 = vmatpush2.bf16.msra.mxu1 %v726_v35 }
  0x47   :  { %366 = vmatprep.subr.bf16.mxu1 %v727_v36 }
  0x4a   :  { %367 = vmatpush2.bf16.msra.mxu1 %v729_v37 }
  0x4b   :  { %368 = vmatprep.subr.bf16.mxu1 %v730_v38 }
  0x4e   :  { %369 = vmatpush2.bf16.msra.mxu1 %v732_v39 }
  0xd7   :  { %v119_v55 = vpop.f32.mrf.mxu0 }
  0xd8   :  { %v120_v62 = vadd.f32 %v119_v55, %v54_v57 }
  0xd9   :  { %v121_v58 = vpop.f32.mrf.mxu0 }
  0xda   :  { %v122_v60 = vadd.f32 %v121_v58, %v58_v56  ;;  %v128_v4 = vmax.f32 %v120_v62, 0.0 }
  0xdb   :  { %v123_v59 = vpop.f32.mrf.mxu0 }
  0xdc   :  { %v124_v61 = vadd.f32 %v123_v59, %v54_v57  ;;  %v129_v2 = vmax.f32 %v122_v60, 0.0 }
  0xdd   :  { %v125_v63 = vpop.f32.mrf.mxu0 }
  0xde   :  { %v126_v0 = vadd.f32 %v125_v63, %v58_v56  ;;  %v130_v1 = vmax.f32 %v124_v61, 0.0 }
  0xe0   :  { %v131_v3 = vmax.f32 %v126_v0, 0.0  ;;  %v132_v6 = vpack.c.bf16 %v130_v1, %v128_v4 }
  0xe2   :  { %v133_v5 = vpack.c.bf16 %v131_v3, %v129_v2 }
  0xe4   :  { %370 = vmatprep.mubr.bf16.mxu1 %v133_v5 }
  0xe5   :  { %371 = vmatmul.mubr.bf16.vlgmr.msra.gmra.mxu1 %v132_v6 }
 0x1a5   :  { %v372_v14 = vpop.f32.mrf.mxu1 }
 0x1a6   :  { %v373_v21 = vadd.f32 %v372_v14, %v171_v16 }
 0x1a7   :  { %v374_v17 = vpop.f32.mrf.mxu1 }
 0x1a8   :  { %v375_v19 = vadd.f32 %v374_v17, %v175_v15  ;;  %v381_v27 = vmax.f32 %v373_v21, 0.0 }
 0x1a9   :  { %v376_v18 = vpop.f32.mrf.mxu1 }
 0x1aa   :  { %v377_v20 = vadd.f32 %v376_v18, %v171_v16  ;;  %v382_v25 = vmax.f32 %v375_v19, 0.0 }
 0x1ab   :  { %v378_v22 = vpop.f32.mrf.mxu1 }
 0x1ac   :  { %v379_v23 = vadd.f32 %v378_v22, %v175_v15  ;;  %v383_v24 = vmax.f32 %v377_v20, 0.0 }
 0x1ae   :  { %v384_v26 = vmax.f32 %v379_v23, 0.0  ;;  %v385_v29 = vpack.c.bf16 %v383_v24, %v381_v27 }
 0x1b0   :  { %v386_v28 = vpack.c.bf16 %v384_v26, %v382_v25 }
 0x1b2   :  { %554 = vmatprep.mubr.bf16.mxu0 %v386_v28 }
 0x1b3   :  { %555 = vmatmul.mubr.bf16.vlgmr.msra.gmra.mxu0 %v385_v29 }
 0x273   :  { %v668_v30 = vpop.f32.mrf.mxu0 }
 0x275   :  { %v669_v32 = vpop.f32.mrf.mxu0 }
 0x276   :  { %v670_v33 = vadd.f32 %v669_v32, %v668_v30 }
 0x277   :  { %v671_v34 = vpop.f32.mrf.mxu0 }
 0x278   :  { %v557_v35 = vadd.f32 %v670_v33, %v635_v31 }
 0x279   :  { %v672_v36 = vpop.f32.mrf.mxu0 }
 0x27a   :  { %v565_v37 = vmax.f32 %v557_v35, -20.0  ;;  %v673_v38 = vadd.f32 %v672_v36, %v671_v34 }
 0x27c   :  { %v567_v39 = vmin.f32 %v565_v37, 2.0  ;;  %v560_v40 = vadd.f32 %v673_v38, %v635_v31 }
 0x27e   :  { %v569_v41 = vmul.f32 1.442695, %v567_v39  ;;  %v566_v42 = vmax.f32 %v560_v40, -20.0 }
 0x280   :  { %749 = vpow2.f32 %v569_v41  ;;  %v568_v43 = vmin.f32 %v566_v42, 2.0 }
 0x282   :  { %v571_v44 = vmul.f32 1.442695, %v568_v43 }
 0x284   :  { %751 = vpow2.f32 %v571_v44 }
 0x28d   :  { %v750_v46 = vpop.eup %749 }
 0x28e   :  { %v573_v47 = vmax.f32 %v750_v46, 1e-06 }
 0x290   :  { %v576_v48 = vsel %vm575_vm1, %v557_v35, %v573_v47 }
 0x291   :  { %v752_v49 = vpop.eup %751  ;;  %579 = vst.msk [vmem:[#allocation5] sm:$0xff] %vm578_vm2, %v576_v48 }
 0x292   :  { %v574_v51 = vmax.f32 %v752_v49, 1e-06 }
 0x294   :  { %v577_v52 = vsel %vm575_vm1, %v560_v40, %v574_v51 }
 0x295   :  { %580 = vst.msk [vmem:[#allocation5 + $0x8] sm:$0xff] %vm578_vm2, %v577_v52 }
 0x296   :  { %784 = shalt.err (!%p781_p9)
}
 0x297   :  { %592 = dma.vmem_to_hbm [thread:$0]  %s587_s30, 256, %s938_s7, [#allocation4], %s798_s27, %s798_s27, %s799_s28  }
 0x298   :  { %795 = dma.done.wait [#allocation4], 256  }
 0x299   :  { %796 = vsyncadd [#allocation4], 4294967040 }
 0x29a   :  { %596 = vsyncpa [#allocation3], 1 }
 0x29b   :  { %597 = vsyncpa [#allocation4], 1 }

</bundles_post_ra>
